<compile_context>
chip_gen: v5e
topology: v5e:2x2
jax: 0.10.0
libtpu: 0.0.40
codegen_flags: <defaults>
</compile_context>

<pallas_src>
import functools

import jax
import jax.numpy as jnp
from jax import lax
from jax.experimental import pallas as pl
from jax.experimental.pallas import tpu as pltpu

_EPS = 1e-8


def _pixel_norm_kernel(x_ref, o_ref, *, eps, axis):
    """Normalize the block over `axis` (the channel axis of this layout).

    x_ref/o_ref: (1, C, hw_tile) with axis=1, or (1, HW, C) with axis=2.
    """
    x = x_ref[...]
    xf = x.astype(jnp.float32)
    # Per-pixel mean of squares over channels, accumulated in f32.
    ms = jnp.mean(xf * xf, axis=axis, keepdims=True)
    # Exact rsqrt on the EUP slot (matches the reference to tight tolerance).
    inv = lax.rsqrt(ms + eps)
    if x.dtype == jnp.float32:
        o_ref[...] = xf * inv
    else:
        # Sub-32-bit inputs: scale in the input dtype so the whole block is
        # never materialized as f32 (halves VMEM/vreg pressure for bf16).
        o_ref[...] = (x * inv.astype(x.dtype)).astype(o_ref.dtype)


def _vmem_budget_bytes():
    """Per-generation VMEM budgeting (v7x: 64 MiB/TC vs 128 MiB on v5e/v6e)."""
    try:
        cap = pltpu.get_tpu_info().vmem_capacity_bytes
    except Exception:  # conservative fallback if the query is unavailable
        cap = 64 << 20
    budget = min(cap // 4, 24 << 20)      # live pipeline footprint target
    vmem_limit = min(cap // 2, 32 << 20)  # explicit scoped-VMEM request
    return budget, vmem_limit


def _choose_hw_tile(HW, C, itemsize, budget):
    """Largest lane-dense spatial tile whose pipeline footprint fits `budget`.

    Footprint per grid step for a (1, C, t) block: 2 input + 2 output buffers
    (default double-buffering) plus the in-kernel f32 temporaries.
    """
    def footprint(t):
        blk = C * t * itemsize
        f32_tmp = C * t * 4
        return 4 * blk + 2 * f32_tmp

    if HW % 128 != 0:
        # TODO(synk): pad ragged spatial extents to a multiple of 128 instead
        # of falling back to a single whole-HW block.
        return HW

    tile = 128  # smallest lane-dense tile; realistic C keeps this in budget
    for cand in (4096, 2048, 1024, 512, 256, 128):
        if HW % cand == 0 and footprint(cand) <= budget:
            tile = cand
            break
    return tile


def pixel_norm(x_nchw, *, eps=_EPS):
    """Pallas PixelNorm on an NCHW tensor; returns NCHW."""
    N, C, H, W = x_nchw.shape
    HW = H * W
    itemsize = jnp.dtype(x_nchw.dtype).itemsize
    budget, vmem_limit = _vmem_budget_bytes()

    total_bytes = N * C * HW * itemsize
    cost = pl.CostEstimate(
        flops=3 * N * C * HW,
        transcendentals=N * HW,
        bytes_accessed=2 * total_bytes,
    )

    if HW >= 128 or C < 128:
        # Layout (N, C, HW): HW on the 128-lane axis -> lane-dense loads and
        # stores; the channel reduction runs on the cheap sublane axis.
        # The reshape is a contiguous collapse (no HBM data movement).
        x3 = x_nchw.reshape(N, C, HW)
        hw_tile = _choose_hw_tile(HW, C, itemsize, budget)
        n_hw = HW // hw_tile

        # v7x megacore: make sure big single-batch inputs still give both
        # TensorCores at least one grid step each.
        if N == 1 and n_hw == 1 and hw_tile % 256 == 0:
            hw_tile //= 2
            n_hw = 2

        out3 = pl.pallas_call(
            functools.partial(_pixel_norm_kernel, eps=eps, axis=1),
            out_shape=jax.ShapeDtypeStruct((N, C, HW), x3.dtype),
            grid=(N, n_hw),
            in_specs=[pl.BlockSpec((1, C, hw_tile), lambda n, i: (n, 0, i))],
            out_specs=pl.BlockSpec((1, C, hw_tile), lambda n, i: (n, 0, i)),
            compiler_params=pltpu.CompilerParams(
                dimension_semantics=("parallel", "parallel"),
                vmem_limit_bytes=vmem_limit),
            cost_estimate=cost,
        )(x3)
        return out3.reshape(N, C, H, W)

    # Deep ProGAN layers (HW = 16 or 64 < 128, C >= 128): an HW-wide lane dim
    # would force masked vst.msk partial stores (7/8 of each store wasted at
    # HW=16), so present the data as (N, HW, C) with C lane-dense and reduce
    # across lanes (XLU).  The wrapper transpose only touches N*C*HW elements,
    # which is tiny at these layer sizes.
    x3 = jnp.transpose(x_nchw.reshape(N, C, HW), (0, 2, 1))
    out3 = pl.pallas_call(
        functools.partial(_pixel_norm_kernel, eps=eps, axis=2),
        out_shape=jax.ShapeDtypeStruct((N, HW, C), x3.dtype),
        grid=(N,),
        in_specs=[pl.BlockSpec((1, HW, C), lambda n: (n, 0, 0))],
        out_specs=pl.BlockSpec((1, HW, C), lambda n: (n, 0, 0)),
        compiler_params=pltpu.CompilerParams(
            dimension_semantics=("parallel",),
            vmem_limit_bytes=vmem_limit),
        cost_estimate=cost,
    )(x3)
    return jnp.transpose(out3, (0, 2, 1)).reshape(N, C, H, W)


class PixelNormPallas:
    """Mirror of the PyTorch PixelNorm module (epsilon = 1e-8)."""

    def __init__(self):
        self.epsilon = _EPS

    def __call__(self, x_nchw):
        return pixel_norm(x_nchw, eps=self.epsilon)


def _reference_forward(x_nchw, eps=_EPS):
    """Pure-JAX reference reproducing the PyTorch forward."""
    return x_nchw / jnp.sqrt(jnp.mean(x_nchw ** 2, axis=1, keepdims=True) + eps)


if __name__ == "__main__":
    key = jax.random.PRNGKey(0)
    module = PixelNormPallas()

    # Main test shape (as implied by the module): N=2, C=4, H=W=16.
    N, C, H, W = 2, 4, 16, 16
    x = jax.random.normal(key, (N, C, H, W), jnp.float32)
    out = jax.block_until_ready(module(x))
    assert out.shape == (N, C, H, W), out.shape
    ref = jax.block_until_ready(_reference_forward(x))
    assert jnp.allclose(out, ref, rtol=1e-5, atol=1e-5), float(
        jnp.max(jnp.abs(out - ref)))

    # Deep-layer shape (exercises the lane-dense-channel path: HW<128, C>=128).
    x2 = jax.random.normal(jax.random.PRNGKey(1), (2, 128, 4, 4), jnp.float32)
    out2 = jax.block_until_ready(module(x2))
    ref2 = jax.block_until_ready(_reference_forward(x2))
    assert jnp.allclose(out2, ref2, rtol=1e-5, atol=1e-5), float(
        jnp.max(jnp.abs(out2 - ref2)))

    print("KERNEL_OK")
</pallas_src>

<mosaic_0001>
module attributes {stable_mosaic.version = 11 : i64} {
  func.func @_pixel_norm_kernel(%arg0: i32, %arg1: i32, %arg2: memref<1x4x256xf32, #tpu.memory_space<vmem>>, %arg3: memref<1x4x256xf32, #tpu.memory_space<vmem>>) attributes {dimension_semantics = [#tpu.dimension_semantics<parallel>, #tpu.dimension_semantics<parallel>], iteration_bounds = array<i64: 2, 1>, scalar_prefetch = 0 : i64, scratch_operands = 0 : i64, tpu.core_type = #tpu.core_type<tc>, window_params = [{transform_indices = @transform_0, window_bounds = array<i64: 1, 4, 256>}, {transform_indices = @transform_1, window_bounds = array<i64: 1, 4, 256>}]} {
    %c0 = arith.constant 0 : index
    %c0_0 = arith.constant 0 : index
    %c0_1 = arith.constant 0 : index
    %0 = vector.load %arg2[%c0, %c0_0, %c0_1] : memref<1x4x256xf32, #tpu.memory_space<vmem>>, vector<1x4x256xf32>
    %1 = arith.mulf %0, %0 : vector<1x4x256xf32>
    %cst = arith.constant dense<0.000000e+00> : vector<1x256xf32>
    %2 = vector.multi_reduction <add>, %1, %cst [1] : vector<1x4x256xf32> to vector<1x256xf32>
    %3 = vector.shape_cast %2 : vector<1x256xf32> to vector<1x1x256xf32>
    %cst_2 = arith.constant 4.000000e+00 : f32
    %4 = vector.broadcast %cst_2 : f32 to vector<1x1x256xf32>
    %5 = arith.divf %3, %4 : vector<1x1x256xf32>
    %cst_3 = arith.constant 9.99999993E-9 : f32
    %6 = vector.broadcast %cst_3 : f32 to vector<1x1x256xf32>
    %7 = arith.addf %5, %6 : vector<1x1x256xf32>
    %8 = math.rsqrt %7 : vector<1x1x256xf32>
    %9 = vector.broadcast %8 : vector<1x1x256xf32> to vector<1x4x256xf32>
    %10 = arith.mulf %0, %9 : vector<1x4x256xf32>
    %c0_4 = arith.constant 0 : index
    %c0_5 = arith.constant 0 : index
    %c0_6 = arith.constant 0 : index
    %11 = vector.load %arg3[%c0_4, %c0_5, %c0_6] : memref<1x4x256xf32, #tpu.memory_space<vmem>>, vector<1x4x256xf32>
    tpu.vector_store %arg3[%c0_4, %c0_5, %c0_6], %10 {strides = array<i32>} : memref<1x4x256xf32, #tpu.memory_space<vmem>>, vector<1x4x256xf32>,
    return
  }
  func.func @transform_0(%arg0: i32, %arg1: i32) -> (i32, i32, i32) {
    %c0_i32 = arith.constant 0 : i32
    %c0_i32_0 = arith.constant 0 : i32
    return %arg0, %c0_i32, %arg1 : i32, i32, i32
  }
  func.func @transform_1(%arg0: i32, %arg1: i32) -> (i32, i32, i32) {
    %c0_i32 = arith.constant 0 : i32
    %c0_i32_0 = arith.constant 0 : i32
    return %arg0, %c0_i32, %arg1 : i32, i32, i32
  }
}

</mosaic_0001>

<bundles_post_ra>
// kernel: tpu_custom_call.1
= control target key start
LH: loop header
LB: loop body
LE: loop exit
PB: predicated region body
PF: predicated region fallthrough
CT: control target
= control target key end

     0   :  { %6 = vsyncpa [#allocation3], 0  ;;  %s657_s0 = inlined_call_operand.hbm [shape: f32[2,4,256], index: 0, kind: input, shape index: {}]   ;;  %s658_s1 = inlined_call_operand.hbm [shape: f32[2,4,256], index: 1, kind: output, shape index: {}]  }
   0x1   :  { %8 = vsyncpa [#allocation3 + $0x1], 0 }
   0x2   :  { %9 = vsyncpa [#allocation4], 0 }
   0x3   :  { %11 = vsyncpa [#allocation4 + $0x1], 0  ;;  %s530_s6 = smov 0   ;;  %s532_s7 = smov 0  }
   0x4   :  { %s534_s8 = smov 0   ;;  %s536_s9 = smov 0  }
   0x5   :  { %s538_s10 = smov 0   ;;  %s540_s11 = smov 0  }
   0x6 LB: > { %s319_s12 = sadd.s32 4294967295, %s517_s11   ;;  %s320_s13 = sadd.s32 4294967294, %s517_s11   ;;  %s517_s11 = sphi %s540_s11, %s17_s11   ;;  %s513_s10 = sphi %s538_s10, %s667_s10   ;;  %s509_s9 = sphi %s536_s9, %s666_s9   ;;  %s505_s8 = sphi %s534_s8, %s665_s8   ;;  %s501_s7 = sphi %s532_s7, %s664_s7   ;;  %s497_s6 = sphi %s530_s6, %s663_s6  }
   0x7   : > { %s29_s14 = sadd.s32 1, %s513_s10  ;;  %s38_s15 = sadd.s32 1, %s505_s8 }
   0x8   : > { %p31_p0 = scmp.ge.s32.totalorder %s29_s14, 2  ;;  %p45_p1 = scmp.ne.s32.totalorder %s505_s8, %s501_s7 }
   0x9   : > { %p46_p2 = scmp.eq.s32.totalorder %s517_s11, 0  ;;  %p51_p3 = scmp.ne.s32.totalorder %s501_s7, %s497_s6 }
   0xa   : > { %s669_s14 = smov (%p31_p0, %s29_s14), 0  ;;  %p52_p5 = scmp.eq.s32.totalorder %s319_s12, 0 }
   0xb   : > { %p571_p4 = por %p46_p2, %p45_p1  ;;  %s33_s17 = ssub.s32 %s513_s10, %s669_s14 }
   0xc   : > { %p77_p6 = scmp.eq.s32.totalorder %s319_s12, 1  ;;  %p36_p7 = scmp.eq.s32.totalorder %s33_s17, 0 }
   0xd   : > { %p577_p8 = por %p52_p5, %p51_p3  ;;  %p83_p10 = scmp.eq.s32.totalorder %s320_s13, 1 }
   0xe   : > { %p581_p9 = por %p77_p6, %p45_p1  ;;  %p322_p12 = scmp.ge.s32.totalorder %s517_s11, 2 }
   0xf   : > { %s586_s20 = scalar_select %p36_p7, %s505_s8, %s38_s15  }
  0x10   : > { %p588_p11 = por %p83_p10, %p51_p3  ;;  %p348_p13 = scmp.lt.s32.totalorder %s517_s11, 2 }
  0x11   : > { %s103_s22 = sand.u32 1, %s505_s8   ;;  %s334_s24 = sshll.u32 %s513_s10, 3 }
  0x12   : > { %s323_s23 = sshll.u32 %s103_s22, 3  ;;  %s114_s27 = scalar_lea.hbm %s657_s0, %s334_s24 }
  0x13   : > { %s107_s28 = scalar_lea.vmem [#allocation2], %s323_s23  ;;  %s116_s30 = sshll.u32 %s114_s27, 4  ;;  %s117_s30 = int_to_ptr.hbm [resolvable:$true] %s116_s30 }
  0x14   : > { %s118_s29 = sshll.u32 %s107_s28, 4  ;;  %p341_p0 = pnand %p348_p13, %p571_p4  ;;  %s119_s29 = int_to_ptr.vmem [resolvable:$true] %s118_s29 }
  0x15   : > { %p326_p1 = scmp.ge.s32.totalorder %s517_s11, 1  ;;  %p123_p2 = scmp.lt.s32.totalorder %s517_s11, 3 }
  0x16   : > { %s104_s2 = scalar_lea.sflag [#allocation3], %s103_s22 }
  0x17   : > { %343 = dma.hbm_to_vmem [thread:$0]  (!%p341_p0), %s117_s30, 128, %s119_s29, %s104_s2  }
  0x18   : > { %p124_p3 = pnand %p326_p1, %p123_p2 }
  0x19   : > { %s604_s3 = sand.u32 (!%p124_p3), 1, %s501_s7  }
  0x1a   : > { %127 = sbr.rel (%p124_p3) target bundleno = 87 (0x57), region = 24  ;;  %s327_s4 = sshll.u32 (!%p124_p3), %s604_s3, 3 }
  0x1b   : > { %s130_s5 = scalar_lea.sflag (!%p124_p3), [#allocation3], %s604_s3  ;;  %s133_s12 = scalar_lea.vmem (!%p124_p3), [#allocation2], %s327_s4 }
  0x1f   : > { %488 = dma.done.wait (%p577_p8), %s130_s5, 128  }
  0x20   : > { %490 = vsyncadd (%p577_p8), %s130_s5, 4294967168  ;;  %v519_v0 = vmov 4.0   ;;  %v155_v1 = vld [vmem:[%s133_s12] sm:$0xff]  ;;  %vm163_vm0 = vcmask 1043456   ;;  %s335_s13 = sshll.u32 %s509_s9, 3  ;;  %s152_s18 = scalar_lea.vmem [#allocation5], %s327_s4 }
  0x21   : > { %399 = vrcp.f32 %v519_v0  ;;  %v156_v2 = vmul.f32 %v155_v1, %v155_v1  ;;  %s230_s17 = scalar_lea.hbm %s658_s1, %s335_s13  ;;  %s232_s9 = sshll.u32 %s152_s18, 4  ;;  %s233_s9 = int_to_ptr.vmem [resolvable:$true] %s232_s9 }
  0x22   : > { %s234_s22 = sshll.u32 %s230_s17, 4  ;;  %s217_s23 = scalar_lea.sflag [#allocation4], %s604_s3  ;;  %s235_s22 = int_to_ptr.hbm [resolvable:$true] %s234_s22 }
  0x23   : > { %158 = vst [vmem:[#allocation1] ss:$2 sm:$0xff] %v156_v2  ;;  %s449_s24 = sshra.s32 %s235_s22, 4  ;;  %s455_s28 = scalar_lea.hbm %s658_s1, 16  ;;  %s450_s24 = int_to_ptr.hbm [resolvable:$true] %s449_s24 }
  0x24   : > { %s451_s25 = scalar_lea.hbm %s450_s24, 8  ;;  %p456_p7 = scmp.lt.s32.totalorder %s450_s24, %s658_s1 }
  0x25   : > { %p452_p4 = scmp.ne.s32.totalorder %s450_s24, %s451_s25  ;;  %p457_p8 = scmp.lt.s32.totalorder %s455_s28, %s451_s25 }
  0x27   : > { %v400_v3 = vpop.eup %399  ;;  %p453_p5 = pnand %p452_p4, %p581_p9  ;;  %p458_p10 = por %p457_p8, %p456_p7 }
  0x28   : > { %v179_v4 = vmul.f32 4.0, %v400_v3  ;;  %vm183_vm1 = vweird.f32 %v400_v3 }
  0x29   : > { %p454_p6 = pneg %p453_p5 }
  0x2a   : > { %v180_v5 = vsub.f32 1.0, %v179_v4  ;;  %v159_v6 = vld.sshfl [vmem:[#allocation1] sm:$0xff pattern:$0x75316420] }
  0x2b   : > { %v160_v7 = vld.sshfl [vmem:[#allocation1 + $0x8] sm:$0xff pattern:$0x75316420]  ;;  %v164_v8 = vsel %vm163_vm0, %v159_v6, 0.0  ;;  %p459_p13 = pnand %p458_p10, %p454_p6 }
  0x2c   : > { %v171_v9 = vsel %vm163_vm0, %v160_v7, 0.0  ;;  %v165_v10 = vrot.slane %v164_v8, 4  ;;  %v181_v12 = vmul.f32 %v400_v3, %v180_v5 }
  0x2d   : > { %v172_v11 = vrot.slane %v171_v9, 4 }
  0x2e   : > { %v166_v13 = vadd.f32 %v165_v10, %v164_v8  ;;  %v182_v17 = vadd.f32 %v400_v3, %v181_v12 }
  0x2f   : > { %v173_v14 = vadd.f32 %v172_v11, %v171_v9 }
  0x30   : > { %v167_v15 = vrot.slane %v166_v13, 2  ;;  %v184_v22 = vsel %vm183_vm1, %v400_v3, %v182_v17 }
  0x31   : > { %v174_v16 = vrot.slane %v173_v14, 2 }
  0x32   : > { %v168_v18 = vadd.f32 %v167_v15, %v166_v13 }
  0x33   : > { %v175_v19 = vadd.f32 %v174_v16, %v173_v14 }
  0x34   : > { %v169_v20 = vrot.slane %v168_v18, 1 }
  0x35   : > { %v176_v21 = vrot.slane %v175_v19, 1 }
  0x36   : > { %v170_v23 = vadd.f32 %v169_v20, %v168_v18 }
  0x37   : > { %v177_v24 = vadd.f32 %v176_v21, %v175_v19 }
  0x38   : > { %v185_v25 = vmul.f32 %v184_v22, %v170_v23 }
  0x39   : > { %v186_v26 = vmul.f32 %v184_v22, %v177_v24 }
  0x3a   : > { %v187_v27 = vadd.f32 1e-08, %v185_v25 }
  0x3b   : > { %v188_v28 = vadd.f32 1e-08, %v186_v26 }
  0x3c   : > { %401 = vrsqrt.f32 %v187_v27  ;;  %vm195_vm6 = vweird.f32 %v187_v27 }
  0x3d   : > { %403 = vrsqrt.f32 %v188_v28  ;;  %vm205_vm4 = vweird.f32 %v188_v28 }
  0x42   : > { %v402_v29 = vpop.eup %401 }
  0x43   : > { %v404_v30 = vpop.eup %403  ;;  %v190_v31 = vmul.f32 %v402_v29, %v187_v27  ;;  %vm196_vm3 = vweird.f32 %v402_v29 }
  0x44   : > { %v200_v32 = vmul.f32 %v404_v30, %v188_v28  ;;  %vm206_vm2 = vweird.f32 %v404_v30  ;;  %vm197_vm7 = vmor %vm195_vm6, %vm196_vm3 }
  0x45   : > { %v191_v33 = vmul.f32 %v402_v29, %v190_v31  ;;  %vm207_vm5 = vmor %vm205_vm4, %vm206_vm2 }
  0x46   : > { %v201_v34 = vmul.f32 %v404_v30, %v200_v32 }
  0x47   : > { %v192_v35 = vmul.f32 0.5, %v191_v33 }
  0x48   : > { %v202_v36 = vmul.f32 0.5, %v201_v34 }
  0x49   : > { %v193_v37 = vsub.f32 1.5, %v192_v35 }
  0x4a   : > { %v203_v38 = vsub.f32 1.5, %v202_v36 }
  0x4b   : > { %v194_v39 = vmul.f32 %v402_v29, %v193_v37 }
  0x4c   : > { %v204_v40 = vmul.f32 %v404_v30, %v203_v38 }
  0x4d   : > { %v198_v43 = vsel %vm197_vm7, %v402_v29, %v194_v39 }
  0x4e   : > { %v208_v41 = vsel %vm207_vm5, %v404_v30, %v204_v40 }
  0x4f   : > { %v211_v42 = vrot.slane %v208_v41, 4 }
  0x51   : > { %v212_v44 = vsel %vm163_vm0, %v198_v43, %v211_v42 }
  0x52   : > { %v214_v45 = vmul.f32 %v212_v44, %v155_v1 }
  0x54   : > { %215 = vst [vmem:[%s152_s18] sm:$0xff] %v214_v45 }
  0x55   : > { %462 = shalt.err (!%p459_p13)
}
  0x56   : > { %338 = dma.vmem_to_hbm [thread:$0]  (%p581_p9), %s233_s9, 128, %s235_s22, %s217_s23  }
  0x57 PF: > { %s246_s2 = sand.u32 1, %s497_s6   ;;  %p345_p0 = pnand %p322_p12, %p588_p11 }
  0x58   : > { %s247_s3 = scalar_lea.sflag [#allocation4], %s246_s2 }
  0x59   : > { %p346_p1 = pneg %p345_p0 }
  0x5b   : > { %492 = dma.done.wait (%p346_p1), %s247_s3, 128  }
  0x5c   : > { %494 = vsyncadd (%p346_p1), %s247_s3, 4294967168  ;;  %s17_s11 = sadd.s32 1, %s517_s11   ;;  %s663_s6 = smov %s501_s7 }
  0x5d   : > { %p14_p2 = scmp.ge.s32.totalorder %s17_s11, 4   ;;  %s664_s7 = smov %s505_s8 }
  0x5e   : > { %s665_s8 = smov %s586_s20  ;;  %s666_s9 = smov %s513_s10 }
  0x5f   : > { %s667_s10 = smov %s669_s14  ;;  %16 = sbr.rel (!%p14_p2) target bundleno = 6 (0x6), region = 69 }
  0x64   :  { %253 = vsyncpa [#allocation3], 1 }
  0x65   :  { %255 = vsyncpa [#allocation3 + $0x1], 1 }
  0x66   :  { %256 = vsyncpa [#allocation4], 1 }
  0x67   :  { %258 = vsyncpa [#allocation4 + $0x1], 1 }

</bundles_post_ra>
